<compile_context>
chip_gen: v7x
topology: tpu7x:2x2x1
jax: 0.10.0
libtpu: 0.0.40
codegen_flags: <defaults>
</compile_context>

<pallas_src>
import functools

import jax
import jax.numpy as jnp
from jax.experimental import pallas as pl
from jax.experimental.pallas import tpu as pltpu

_TARGET_BLOCK_BYTES = 8 * 1024 * 1024   # ~8 MiB per block (per perf review)
_LANE_CANDIDATES = (4096, 2048, 1024, 512, 256, 128)


# --------------------------------------------------------------------------- #
# Kernel
# --------------------------------------------------------------------------- #
def _piecewise_exp_kernel(x_ref, o_ref, *, alpha, spiking):
    x = x_ref[...]
    if spiking:
        # heaviside forward
        o_ref[...] = (x >= 0).astype(o_ref.dtype)
        return
    # Primitive function of the surrogate gradient.
    # Compute natively in f32 / bf16 (v6e/v7x have bf16 VALU+EUP; halves vreg
    # pressure for bf16).  Other dtypes (fp16 / int / fp8) upcast to f32.
    if x.dtype == jnp.float32 or x.dtype == jnp.bfloat16:
        xf = x
    else:
        xf = x.astype(jnp.float32)
    e = 0.5 * jnp.exp(-alpha * jnp.abs(xf))      # exp arg <= 0: no overflow
    o_ref[...] = jnp.where(xf >= 0, 1.0 - e, e).astype(o_ref.dtype)


def _piecewise_exp_jax(x, alpha, spiking):
    """Pure-JAX path for ragged / tiny inputs (XLA-fused, already at roofline)."""
    if spiking:
        return (x >= 0).astype(x.dtype)
    if x.dtype == jnp.float32 or x.dtype == jnp.bfloat16:
        xf = x
    else:
        xf = x.astype(jnp.float32)
    e = 0.5 * jnp.exp(-alpha * jnp.abs(xf))
    return jnp.where(xf >= 0, 1.0 - e, e).astype(x.dtype)


# --------------------------------------------------------------------------- #
# Wrapper helpers
# --------------------------------------------------------------------------- #
def _pick_lane(n):
    """Widest lane width (multiple of 128) that divides n exactly; 0 if none."""
    for lane in _LANE_CANDIDATES:
        if n >= lane and n % lane == 0:
            return lane
    return 0


def _sublane_multiple(itemsize):
    # 8 for 4-byte, 16 for 2-byte, 32 for 1-byte dtypes (packed sublanes).
    return max(8, 32 // max(1, itemsize))


def _num_tensorcores_per_chip():
    """2 on v7x (megacore-style dual TC), else 1.  Never raises."""
    try:
        kind = jax.devices()[0].device_kind.lower()
    except Exception:
        return 1
    return 2 if ("v7" in kind or "7x" in kind) else 1


# --------------------------------------------------------------------------- #
# Forward
# --------------------------------------------------------------------------- #
def piecewise_exp_forward(x, alpha=1.0, spiking=True, donate_input=False):
    """Pallas TPU implementation of PiecewiseExp.forward."""
    orig_shape = x.shape
    dtype = x.dtype
    alpha = float(alpha)
    spiking = bool(spiking)

    flat = x.reshape(-1)            # contiguous -> metadata-only reshape
    n = flat.shape[0]

    lane = _pick_lane(n)
    if lane == 0:
        # Ragged (n % 128 != 0) or tiny input: pure-JAX fused elementwise for
        # the whole array.  No padded copies, no slice+concat round trips.
        return _piecewise_exp_jax(flat, alpha, spiking).reshape(orig_shape)

    x2d = flat.reshape(-1, lane)    # lane-dense 2D slab
    rows = x2d.shape[0]

    itemsize = jnp.dtype(dtype).itemsize
    sub = _sublane_multiple(itemsize)

    # ~8 MiB blocks, rounded down to the packed sublane multiple.
    row_tile = max(sub, (_TARGET_BLOCK_BYTES // (lane * itemsize)) // sub * sub)

    if row_tile >= rows:
        if _num_tensorcores_per_chip() >= 2 and rows >= 2 * sub:
            # v7x only: split into two (near-)balanced blocks so both
            # TensorCores get work via dimension_semantics="parallel".
            row_tile = (((rows + 1) // 2) + sub - 1) // sub * sub
            row_tile = min(row_tile, rows)
        else:
            # Single-TC v5e/v6e: one full-extent block (always legal) when it
            # fits VMEM; an extra grid step would be pure per-step overhead.
            row_tile = rows

    grid = (pl.cdiv(rows, row_tile),)
    kernel = functools.partial(_piecewise_exp_kernel, alpha=alpha, spiking=spiking)

    # Cover the double-buffered footprint (in + out, 2 buffers each) with
    # headroom; stays well under v7x's 64 MiB physical VMEM.
    block_bytes = row_tile * lane * itemsize
    vmem_limit = min(56 * 1024 * 1024,
                     max(16 * 1024 * 1024, 4 * block_bytes + 8 * 1024 * 1024))

    out2d = pl.pallas_call(
        kernel,
        out_shape=jax.ShapeDtypeStruct((rows, lane), dtype),
        grid=grid,
        in_specs=[pl.BlockSpec((row_tile, lane), lambda i: (i, 0))],
        out_specs=pl.BlockSpec((row_tile, lane), lambda i: (i, 0)),
        compiler_params=pltpu.CompilerParams(
            dimension_semantics=("parallel",),
            vmem_limit_bytes=int(vmem_limit),
        ),
        input_output_aliases=({0: 0} if donate_input else {}),
    )(x2d)

    return out2d.reshape(orig_shape)


class PiecewiseExp:
    """JAX/Pallas port of spikingjelly PiecewiseExp (forward only)."""

    def __init__(self, alpha=1.0, spiking=True):
        self.alpha = alpha
        self.spiking = spiking
        # TODO(synk): surrogate gradient (backward, alpha/2 * exp(-alpha*|x|))
        # not wired via jax.custom_vjp; only the forward pass is implemented.

    def __call__(self, x):
        return piecewise_exp_forward(x, self.alpha, self.spiking)


# --------------------------------------------------------------------------- #
# Reference + self-test
# --------------------------------------------------------------------------- #
def _reference(x, alpha, spiking):
    """Mirror of the PyTorch module's math (computed in f32)."""
    xf = x.astype(jnp.float32)
    mask = (xf >= 0).astype(jnp.float32)
    if spiking:
        return mask.astype(x.dtype)
    sign = mask * 2 - 1
    exp_x = 0.5 * jnp.exp(sign * xf * (-alpha))
    return (mask - exp_x * sign).astype(x.dtype)


if __name__ == "__main__":
    key = jax.random.PRNGKey(0)
    x = jax.random.normal(key, (2, 4, 16, 16), dtype=jnp.float32)

    # spiking=True (default PyTorch module behavior): heaviside forward
    mod_spiking = PiecewiseExp(alpha=2.0, spiking=True)
    y_spk = jax.block_until_ready(mod_spiking(x))
    assert y_spk.shape == x.shape and y_spk.dtype == x.dtype
    assert jnp.array_equal(y_spk, _reference(x, 2.0, True)), "spiking forward mismatch"

    # spiking=False: primitive function of the surrogate gradient
    mod_prim = PiecewiseExp(alpha=2.0, spiking=False)
    y_prim = jax.block_until_ready(mod_prim(x))
    assert y_prim.shape == x.shape and y_prim.dtype == x.dtype
    assert jnp.allclose(y_prim, _reference(x, 2.0, False), atol=1e-6), \
        "primitive forward mismatch"

    # Ragged element count (n % 128 != 0): pure-JAX fallback path.
    x_ragged = jax.random.normal(jax.random.PRNGKey(1), (3, 7, 13), dtype=jnp.float32)
    y_ragged = jax.block_until_ready(piecewise_exp_forward(x_ragged, 2.0, False))
    assert jnp.allclose(y_ragged, _reference(x_ragged, 2.0, False), atol=1e-6)

    # bf16 path (native low-precision compute in-kernel).
    x_bf16 = x.astype(jnp.bfloat16)
    y_bf_spk = jax.block_until_ready(piecewise_exp_forward(x_bf16, 2.0, True))
    assert y_bf_spk.dtype == jnp.bfloat16
    assert jnp.array_equal(y_bf_spk, _reference(x_bf16, 2.0, True))
    y_bf_prim = jax.block_until_ready(piecewise_exp_forward(x_bf16, 2.0, False))
    assert jnp.allclose(y_bf_prim.astype(jnp.float32),
                        _reference(x_bf16, 2.0, False).astype(jnp.float32),
                        atol=5e-2)

    print("KERNEL_OK")
</pallas_src>

<mosaic_0001>
module attributes {stable_mosaic.version = 11 : i64} {
  func.func @_piecewise_exp_kernel(%arg0: i32, %arg1: memref<1x2048xf32, #tpu.memory_space<vmem>>, %arg2: memref<1x2048xf32, #tpu.memory_space<vmem>>) attributes {dimension_semantics = [#tpu.dimension_semantics<parallel>], iteration_bounds = array<i64: 1>, scalar_prefetch = 0 : i64, scratch_operands = 0 : i64, tpu.core_type = #tpu.core_type<tc>, window_params = [{transform_indices = @transform_0, window_bounds = array<i64: 1, 2048>}, {transform_indices = @transform_1, window_bounds = array<i64: 1, 2048>}]} {
    %c0 = arith.constant 0 : index
    %c0_0 = arith.constant 0 : index
    %0 = vector.load %arg1[%c0, %c0_0] : memref<1x2048xf32, #tpu.memory_space<vmem>>, vector<1x2048xf32>
    %cst = arith.constant 0.000000e+00 : f32
    %1 = vector.broadcast %cst : f32 to vector<1x2048xf32>
    %2 = arith.cmpf oge, %0, %1 : vector<1x2048xf32>
    %3 = arith.extui %2 : vector<1x2048xi1> to vector<1x2048xi32>
    %4 = arith.sitofp %3 : vector<1x2048xi32> to vector<1x2048xf32>
    %c0_1 = arith.constant 0 : index
    %c0_2 = arith.constant 0 : index
    %5 = vector.load %arg2[%c0_1, %c0_2] : memref<1x2048xf32, #tpu.memory_space<vmem>>, vector<1x2048xf32>
    tpu.vector_store %arg2[%c0_1, %c0_2], %4 {strides = array<i32>} : memref<1x2048xf32, #tpu.memory_space<vmem>>, vector<1x2048xf32>,
    return
  }
  func.func @transform_0(%arg0: i32) -> (i32, i32) {
    %c0_i32 = arith.constant 0 : i32
    %c0_i32_0 = arith.constant 0 : i32
    return %arg0, %c0_i32 : i32, i32
  }
  func.func @transform_1(%arg0: i32) -> (i32, i32) {
    %c0_i32 = arith.constant 0 : i32
    %c0_i32_0 = arith.constant 0 : i32
    return %arg0, %c0_i32 : i32, i32
  }
}

</mosaic_0001>

<bundles_post_ra>
// kernel: tpu_custom_call.1
= control target key start
LH: loop header
LB: loop body
LE: loop exit
PB: predicated region body
PF: predicated region fallthrough
CT: control target
= control target key end

     0   :  { %6 = vsyncpa [#allocation3], 0  ;;  %s136_s0 = inlined_call_operand.hbm [shape: f32[1,2048], index: 0, kind: input, shape index: {}]   ;;  %s137_s1 = inlined_call_operand.hbm [shape: f32[1,2048], index: 1, kind: output, shape index: {}]  }
   0x1   :  { %7 = vsyncpa [#allocation4], 0  ;;  %s99_s6 = smov [#allocation2]   ;;  %s51_s10 = scalar_lea.hbm %s136_s0, 256 }
   0x2   :  { %s14_s7 = sshll.u32 %s99_s6, 4  ;;  %p52_p0 = scmp.ne.s32.totalorder %s136_s0, %s51_s10  ;;  %s15_s7 = int_to_ptr.vmem [resolvable:$true] %s14_s7 }
   0x3   :  { %p55_p1 = scmp.lt.u32.totalorder %s51_s10, %s136_s0 }
   0x5   :  { %p57_p2 = pnand %p55_p1, %p52_p0 }
   0x7   :  { %60 = shalt.err (!%p57_p2)
}
   0x8   :  { %s61_s15 = scalar_lea.vmem %s15_s7, 256  ;;  %p66_p4 = scmp.lt.s32.totalorder %s15_s7, %s15_s7 }
   0x9   :  { %p62_p3 = scmp.ne.s32.totalorder %s15_s7, %s61_s15  ;;  %p67_p5 = scmp.lt.s32.totalorder %s61_s15, %s61_s15 }
   0xb   :  { %p68_p6 = por %p67_p5, %p66_p4 }
   0xd   :  { %p69_p7 = pnand %p68_p6, %p62_p3 }
   0xf   :  { %72 = shalt.err (!%p69_p7)
}
  0x10   :  { %17 = dma.hbm_to_vmem [thread:$0]  %s136_s0, 256, %s15_s7, [#allocation3]  }
  0x11   :  { %95 = dma.done.wait [#allocation3], 256  }
  0x12   :  { %96 = vsyncadd [#allocation3], 4294967040  ;;  %s100_s18 = smov [#allocation5]   ;;  %v21_v0 = vld [vmem:[#allocation2] sm:$0xff]  ;;  %v22_v1 = vld [vmem:[#allocation2 + $0x8] sm:$0xff]  ;;  %v101_v2 = vmov 0.0  }
  0x13   :  { %s37_s19 = sshll.u32 %s100_s18, 4  ;;  %vm23_vm0 = vcmp.ge.f32.partialorder %v21_v0, 0.0  ;;  %vm24_vm1 = vcmp.ge.f32.partialorder %v22_v1, 0.0  ;;  %s38_s19 = int_to_ptr.vmem [resolvable:$true] %s37_s19 }
  0x14   :  { %v46_v3 = vsel %vm23_vm0, 1.0, %v101_v2  ;;  %v47_v4 = vsel %vm24_vm1, 1.0, %v101_v2  ;;  %s73_s20 = scalar_lea.vmem %s38_s19, 256  ;;  %p78_p9 = scmp.lt.s32.totalorder %s38_s19, %s38_s19 }
  0x15   :  { %29 = vst [vmem:[#allocation5] sm:$0xff] %v46_v3  ;;  %30 = vst [vmem:[#allocation5 + $0x8] sm:$0xff] %v47_v4  ;;  %p74_p8 = scmp.ne.s32.totalorder %s38_s19, %s73_s20  ;;  %p79_p10 = scmp.lt.s32.totalorder %s73_s20, %s73_s20 }
  0x17   :  { %p80_p11 = por %p79_p10, %p78_p9 }
  0x19   :  { %p81_p12 = pnand %p80_p11, %p74_p8 }
  0x1b   :  { %84 = shalt.err (!%p81_p12)
}
  0x1c   :  { %s85_s22 = scalar_lea.hbm %s137_s1, 256 }
  0x1d   :  { %p86_p13 = scmp.ne.s32.totalorder %s137_s1, %s85_s22  ;;  %p89_p0 = scmp.lt.u32.totalorder %s85_s22, %s137_s1 }
  0x1f   :  { %p91_p1 = pnand %p89_p0, %p86_p13 }
  0x21   :  { %94 = shalt.err (!%p91_p1)
}
  0x22   :  { %40 = dma.vmem_to_hbm [thread:$0]  %s38_s19, 256, %s137_s1, [#allocation4]  }
  0x23   :  { %97 = dma.done.wait [#allocation4], 256  }
  0x24   :  { %98 = vsyncadd [#allocation4], 4294967040 }
  0x25   :  { %44 = vsyncpa [#allocation3], 1 }
  0x26   :  { %45 = vsyncpa [#allocation4], 1 }

</bundles_post_ra>
